<compile_context>
chip_gen: v7x
topology: tpu7x:2x2x1
jax: 0.10.0
libtpu: 0.0.40
codegen_flags: <defaults>
</compile_context>

<pallas_src>
import jax
import jax.numpy as jnp
from jax import lax
from jax.experimental import pallas as pl
from jax.experimental.pallas import tpu as pltpu


def _snico_kernel(qs_ref, ks_ref, out_ref):
    """Fused 4-way NCE.

    qs_ref : [4B, T, C] query sources, group-major blocks of B rows:
             [HA_1, HB_1, HA_2, HB_2]
    ks_ref : [4B, T, C] key / negative sources, group-major:
             [EA_1, EB_1, EA_2, EB_2]
    out_ref: SMEM f32[1, 2]
             out[0,0] = NCE(HA_1,EA_1,EB_1) + NCE(HB_1,EB_1,EA_1)
             out[0,1] = NCE(HA_2,EA_2,EB_2) + NCE(HB_2,EB_2,EA_2)
    """
    inv_t = 1.0 / 0.07     # fold the temperature into one constant multiply
    eps2 = 1e-24           # == (F.normalize eps = 1e-12) ** 2

    qs = qs_ref[...].astype(jnp.float32)                 # [N, T, C]
    ks = ks_ref[...].astype(jnp.float32)                 # [N, T, C]
    n = qs.shape[0]
    b = n // 4

    # Temporal mean + L2 normalize along C (rsqrt -> EUP slot, no divides).
    q_mean = jnp.mean(qs, axis=1)                        # [N, C]
    k_mean = jnp.mean(ks, axis=1)                        # [N, C]
    qn = q_mean * lax.rsqrt(
        jnp.maximum(jnp.sum(q_mean * q_mean, axis=-1, keepdims=True), eps2))
    kn = k_mean * lax.rsqrt(
        jnp.maximum(jnp.sum(k_mean * k_mean, axis=-1, keepdims=True), eps2))

    # Positive logit per row: q . k / T.
    l_pos = jnp.sum(qn * kn, axis=-1, keepdims=True) * inv_t        # [N, 1]

    # NCE group g takes its negatives from the *other* E tensor of the same
    # pair set (groups 0<->1 and 2<->3).  Instead of gathering / duplicating
    # the big ks tensor, pair each ks block with the pair-swapped queries and
    # positive logits; the per-pair-set loss sums are invariant under this
    # within-pair permutation.
    def _swap_pairs(x):      # blocks [g0, g1, g2, g3] -> [g1, g0, g3, g2]
        return jnp.concatenate(
            [x[b:2 * b], x[0:b], x[3 * b:4 * b], x[2 * b:3 * b]], axis=0)

    qn_sw = _swap_pairs(qn)                                          # [N, C]
    l_pos_sw = _swap_pairs(l_pos)                                    # [N, 1]

    # Per-snippet 1/||neg||; the normalized negatives are never materialized.
    neg_inv = lax.rsqrt(
        jnp.maximum(jnp.sum(ks * ks, axis=-1), eps2))                # [N, T]

    # q . neg contraction on the MXU: (N,1,C) x (N,T,C) -> (N,1,T).
    l_neg = jnp.einsum('bqc,bkc->bqk', qn_sw[:, None, :], ks,
                       preferred_element_type=jnp.float32)[:, 0, :]  # [N, T]
    l_neg = l_neg * neg_inv * inv_t

    # CrossEntropy against class 0  ==  logsumexp([l_pos, l_neg]) - l_pos.
    m = jnp.maximum(l_pos_sw, jnp.max(l_neg, axis=-1, keepdims=True))
    se = jnp.exp(l_pos_sw - m) + jnp.sum(jnp.exp(l_neg - m), axis=-1,
                                         keepdims=True)
    loss_rows = (m + jnp.log(se)) - l_pos_sw                         # [N, 1]

    # Per-NCE loss = mean over batch; emit the two pair-set sums.
    out_ref[0, 0] = jnp.sum(loss_rows[0:2 * b]) * (1.0 / b)
    out_ref[0, 1] = jnp.sum(loss_rows[2 * b:4 * b]) * (1.0 / b)


def snico_loss_2(contrast_pairs, contrast_pairs_2, s2):
    """loss = NCE(HA1,EA1,EB1)+NCE(HB1,EB1,EA1) + s2*(NCE(HA2,...)+NCE(HB2,...))."""
    q_list = [contrast_pairs['HA'], contrast_pairs['HB'],
              contrast_pairs_2['HA'], contrast_pairs_2['HB']]
    k_list = [contrast_pairs['EA'], contrast_pairs['EB'],
              contrast_pairs_2['EA'], contrast_pairs_2['EB']]
    qs = jnp.concatenate(q_list, axis=0)    # [4B, T, C]
    ks = jnp.concatenate(k_list, axis=0)    # [4B, T, C]

    # Lane-dense layout: zero-pad C to a multiple of 128 (zeros are inert for
    # the temporal means, the L2 norms and the dot products).
    c = qs.shape[-1]
    pad = (-c) % 128
    if pad:
        qs = jnp.pad(qs, ((0, 0), (0, 0), (0, pad)))
        ks = jnp.pad(ks, ((0, 0), (0, 0), (0, pad)))

    # TODO(synk): for production (CoLA-scale T~750, C~2048, large B) shapes add
    # a grid over 4B / T with a VMEM accumulator + "parallel" batch semantics
    # so double-buffered tiles stay inside v7x's 64 MiB VMEM; whole-array
    # residency is correct and fastest at these small sizes.
    out = pl.pallas_call(
        _snico_kernel,
        out_shape=jax.ShapeDtypeStruct((1, 2), jnp.float32),
        in_specs=[pl.BlockSpec(memory_space=pltpu.MemorySpace.VMEM),
                  pl.BlockSpec(memory_space=pltpu.MemorySpace.VMEM)],
        out_specs=pl.BlockSpec(memory_space=pltpu.MemorySpace.SMEM),
    )(qs, ks)
    return out[0, 0] + s2 * out[0, 1]


if __name__ == "__main__":
    key = jax.random.PRNGKey(0)
    B, T, C = 2, 8, 128          # lane-dense feature dim (multiple of 128)
    S2 = 0.5
    subkeys = jax.random.split(key, 8)

    def mk(k):
        return jax.random.normal(k, (B, T, C), jnp.float32)

    contrast_pairs = {'HA': mk(subkeys[0]), 'EA': mk(subkeys[1]),
                      'HB': mk(subkeys[2]), 'EB': mk(subkeys[3])}
    contrast_pairs_2 = {'HA': mk(subkeys[4]), 'EA': mk(subkeys[5]),
                        'HB': mk(subkeys[6]), 'EB': mk(subkeys[7])}

    loss = snico_loss_2(contrast_pairs, contrast_pairs_2, S2)
    jax.block_until_ready(loss)
    print("KERNEL_OK")
</pallas_src>

<mosaic_0001>
module attributes {stable_mosaic.version = 11 : i64} {
  func.func @_snico_kernel(%arg0: memref<8x8x128xf32, #tpu.memory_space<vmem>>, %arg1: memref<8x8x128xf32, #tpu.memory_space<vmem>>, %arg2: memref<1x2xf32, #tpu.memory_space<smem>>) attributes {dimension_semantics = [], scalar_prefetch = 0 : i64, scratch_operands = 0 : i64, tpu.core_type = #tpu.core_type<tc>} {
    %c0 = arith.constant 0 : index
    %c0_0 = arith.constant 0 : index
    %c0_1 = arith.constant 0 : index
    %0 = vector.load %arg0[%c0, %c0_0, %c0_1] : memref<8x8x128xf32, #tpu.memory_space<vmem>>, vector<8x8x128xf32>
    %c0_2 = arith.constant 0 : index
    %c0_3 = arith.constant 0 : index
    %c0_4 = arith.constant 0 : index
    %1 = vector.load %arg1[%c0_2, %c0_3, %c0_4] : memref<8x8x128xf32, #tpu.memory_space<vmem>>, vector<8x8x128xf32>
    %cst = arith.constant dense<0.000000e+00> : vector<8x128xf32>
    %2 = vector.multi_reduction <add>, %0, %cst [1] : vector<8x8x128xf32> to vector<8x128xf32>
    %cst_5 = arith.constant 8.000000e+00 : f32
    %3 = vector.broadcast %cst_5 : f32 to vector<8x128xf32>
    %4 = arith.divf %2, %3 : vector<8x128xf32>
    %cst_6 = arith.constant dense<0.000000e+00> : vector<8x128xf32>
    %5 = vector.multi_reduction <add>, %1, %cst_6 [1] : vector<8x8x128xf32> to vector<8x128xf32>
    %cst_7 = arith.constant 8.000000e+00 : f32
    %6 = vector.broadcast %cst_7 : f32 to vector<8x128xf32>
    %7 = arith.divf %5, %6 : vector<8x128xf32>
    %8 = arith.mulf %4, %4 : vector<8x128xf32>
    %cst_8 = arith.constant dense<0.000000e+00> : vector<8xf32>
    %9 = vector.multi_reduction <add>, %8, %cst_8 [1] : vector<8x128xf32> to vector<8xf32>
    %10 = vector.shape_cast %9 : vector<8xf32> to vector<8x1xf32>
    %cst_9 = arith.constant 1.000000e-24 : f32
    %11 = vector.broadcast %cst_9 : f32 to vector<8x1xf32>
    %12 = arith.maximumf %10, %11 : vector<8x1xf32>
    %13 = math.rsqrt %12 : vector<8x1xf32>
    %14 = vector.broadcast %13 : vector<8x1xf32> to vector<8x128xf32>
    %15 = arith.mulf %4, %14 : vector<8x128xf32>
    %16 = arith.mulf %7, %7 : vector<8x128xf32>
    %cst_10 = arith.constant dense<0.000000e+00> : vector<8xf32>
    %17 = vector.multi_reduction <add>, %16, %cst_10 [1] : vector<8x128xf32> to vector<8xf32>
    %18 = vector.shape_cast %17 : vector<8xf32> to vector<8x1xf32>
    %cst_11 = arith.constant 1.000000e-24 : f32
    %19 = vector.broadcast %cst_11 : f32 to vector<8x1xf32>
    %20 = arith.maximumf %18, %19 : vector<8x1xf32>
    %21 = math.rsqrt %20 : vector<8x1xf32>
    %22 = vector.broadcast %21 : vector<8x1xf32> to vector<8x128xf32>
    %23 = arith.mulf %7, %22 : vector<8x128xf32>
    %24 = arith.mulf %15, %23 : vector<8x128xf32>
    %cst_12 = arith.constant dense<0.000000e+00> : vector<8xf32>
    %25 = vector.multi_reduction <add>, %24, %cst_12 [1] : vector<8x128xf32> to vector<8xf32>
    %26 = vector.shape_cast %25 : vector<8xf32> to vector<8x1xf32>
    %cst_13 = arith.constant 14.2857141 : f32
    %27 = vector.broadcast %cst_13 : f32 to vector<8x1xf32>
    %28 = arith.mulf %26, %27 : vector<8x1xf32>
    %29 = vector.extract_strided_slice %15 {offsets = [2, 0], sizes = [2, 128], strides = [1, 1]} : vector<8x128xf32> to vector<2x128xf32>
    %30 = vector.extract_strided_slice %15 {offsets = [0, 0], sizes = [2, 128], strides = [1, 1]} : vector<8x128xf32> to vector<2x128xf32>
    %31 = vector.extract_strided_slice %15 {offsets = [6, 0], sizes = [2, 128], strides = [1, 1]} : vector<8x128xf32> to vector<2x128xf32>
    %32 = vector.extract_strided_slice %15 {offsets = [4, 0], sizes = [2, 128], strides = [1, 1]} : vector<8x128xf32> to vector<2x128xf32>
    %33 = tpu.concatenate %29, %30, %31, %32 in 0 : vector<2x128xf32>, vector<2x128xf32>, vector<2x128xf32>, vector<2x128xf32> -> vector<8x128xf32>
    %34 = vector.extract_strided_slice %28 {offsets = [2, 0], sizes = [2, 1], strides = [1, 1]} : vector<8x1xf32> to vector<2x1xf32>
    %35 = vector.extract_strided_slice %28 {offsets = [0, 0], sizes = [2, 1], strides = [1, 1]} : vector<8x1xf32> to vector<2x1xf32>
    %36 = vector.extract_strided_slice %28 {offsets = [6, 0], sizes = [2, 1], strides = [1, 1]} : vector<8x1xf32> to vector<2x1xf32>
    %37 = vector.extract_strided_slice %28 {offsets = [4, 0], sizes = [2, 1], strides = [1, 1]} : vector<8x1xf32> to vector<2x1xf32>
    %38 = tpu.concatenate %34, %35, %36, %37 in 0 : vector<2x1xf32>, vector<2x1xf32>, vector<2x1xf32>, vector<2x1xf32> -> vector<8x1xf32>
    %39 = arith.mulf %1, %1 : vector<8x8x128xf32>
    %cst_14 = arith.constant dense<0.000000e+00> : vector<8x8xf32>
    %40 = vector.multi_reduction <add>, %39, %cst_14 [2] : vector<8x8x128xf32> to vector<8x8xf32>
    %cst_15 = arith.constant 1.000000e-24 : f32
    %41 = vector.broadcast %cst_15 : f32 to vector<8x8xf32>
    %42 = arith.maximumf %40, %41 : vector<8x8xf32>
    %43 = math.rsqrt %42 : vector<8x8xf32>
    %44 = vector.shape_cast %33 : vector<8x128xf32> to vector<8x1x128xf32>
    "tpu.trace_start"() <{level = 10 : i32, message = "bqc,bkc->bqk"}> : () -> ()
    %cst_16 = arith.constant dense<0.000000e+00> : vector<8x1x8xf32>
    %45 = tpu.matmul %44, %1, %cst_16 {dimension_numbers = #tpu.dot_dimension_numbers<[2], [2], [1], [1], [0, 0, 0, 1, 1, 1], [0], [0]>} : vector<8x1x128xf32>, vector<8x8x128xf32>, vector<8x1x8xf32> -> vector<8x1x8xf32>
    "tpu.trace_stop"() : () -> ()
    %46 = vector.shape_cast %45 : vector<8x1x8xf32> to vector<8x8xf32>
    %47 = arith.mulf %46, %43 : vector<8x8xf32>
    %cst_17 = arith.constant 14.2857141 : f32
    %48 = vector.broadcast %cst_17 : f32 to vector<8x8xf32>
    %49 = arith.mulf %47, %48 : vector<8x8xf32>
    %cst_18 = arith.constant dense<0xFF800000> : vector<8xf32>
    %50 = vector.multi_reduction <maximumf>, %49, %cst_18 [1] : vector<8x8xf32> to vector<8xf32>
    %51 = vector.shape_cast %50 : vector<8xf32> to vector<8x1xf32>
    %52 = arith.maximumf %38, %51 : vector<8x1xf32>
    %53 = arith.subf %38, %52 : vector<8x1xf32>
    %54 = math.exp %53 : vector<8x1xf32>
    %55 = vector.broadcast %52 : vector<8x1xf32> to vector<8x8xf32>
    %56 = arith.subf %49, %55 : vector<8x8xf32>
    %57 = math.exp %56 : vector<8x8xf32>
    %cst_19 = arith.constant dense<0.000000e+00> : vector<8xf32>
    %58 = vector.multi_reduction <add>, %57, %cst_19 [1] : vector<8x8xf32> to vector<8xf32>
    %59 = vector.shape_cast %58 : vector<8xf32> to vector<8x1xf32>
    %60 = arith.addf %54, %59 : vector<8x1xf32>
    %61 = math.log %60 : vector<8x1xf32>
    %62 = arith.addf %52, %61 : vector<8x1xf32>
    %63 = arith.subf %62, %38 : vector<8x1xf32>
    %64 = vector.extract_strided_slice %63 {offsets = [0, 0], sizes = [4, 1], strides = [1, 1]} : vector<8x1xf32> to vector<4x1xf32>
    %65 = vector.shape_cast %64 : vector<4x1xf32> to vector<1x4x1xf32>
    %cst_20 = arith.constant dense<0.000000e+00> : vector<1xf32>
    %66 = vector.multi_reduction <add>, %65, %cst_20 [1, 2] : vector<1x4x1xf32> to vector<1xf32>
    %67 = vector.shape_cast %66 : vector<1xf32> to vector<1x1x1xf32>
    %68 = vector.extract %67[0, 0, 0] : f32 from vector<1x1x1xf32>
    %cst_21 = arith.constant 5.000000e-01 : f32
    %69 = arith.mulf %68, %cst_21 : f32
    %c0_22 = arith.constant 0 : index
    %c0_23 = arith.constant 0 : index
    %70 = memref.load %arg2[%c0_22, %c0_23] : memref<1x2xf32, #tpu.memory_space<smem>>
    memref.store %69, %arg2[%c0_22, %c0_23] : memref<1x2xf32, #tpu.memory_space<smem>>
    %71 = vector.extract_strided_slice %63 {offsets = [4, 0], sizes = [4, 1], strides = [1, 1]} : vector<8x1xf32> to vector<4x1xf32>
    %72 = vector.shape_cast %71 : vector<4x1xf32> to vector<1x4x1xf32>
    %cst_24 = arith.constant dense<0.000000e+00> : vector<1xf32>
    %73 = vector.multi_reduction <add>, %72, %cst_24 [1, 2] : vector<1x4x1xf32> to vector<1xf32>
    %74 = vector.shape_cast %73 : vector<1xf32> to vector<1x1x1xf32>
    %75 = vector.extract %74[0, 0, 0] : f32 from vector<1x1x1xf32>
    %cst_25 = arith.constant 5.000000e-01 : f32
    %76 = arith.mulf %75, %cst_25 : f32
    %c0_26 = arith.constant 0 : index
    %c1 = arith.constant 1 : index
    %77 = memref.load %arg2[%c0_26, %c1] : memref<1x2xf32, #tpu.memory_space<smem>>
    memref.store %76, %arg2[%c0_26, %c1] : memref<1x2xf32, #tpu.memory_space<smem>>
    return
  }
}

</mosaic_0001>

<bundles_post_ra>
// kernel: tpu_custom_call.1
= control target key start
LH: loop header
LB: loop body
LE: loop exit
PB: predicated region body
PF: predicated region fallthrough
CT: control target
= control target key end

     0   :  { %7 = vsyncpa [#allocation3], 0  ;;  %s1722_s0 = inlined_call_operand.hbm [shape: f32[8,8,128], index: 0, kind: input, shape index: {}]   ;;  %s1723_s1 = inlined_call_operand.hbm [shape: f32[8,8,128], index: 1, kind: input, shape index: {}]   ;;  %s1724_s2 = inlined_call_operand.hbm [shape: f32[1,2], index: 2, kind: output, shape index: {}]  }
   0x1   :  { %8 = vsyncpa [#allocation6], 0 }
   0x2   :  { %9 = vsyncpa [#allocation4], 0  ;;  %s1395_s9 = smov [#allocation2]   ;;  %s1335_s13 = scalar_lea.hbm %s1722_s0, 1024 }
   0x3   :  { %s15_s10 = sshll.u32 %s1395_s9, 4  ;;  %p1336_p0 = scmp.ne.s32.totalorder %s1722_s0, %s1335_s13  ;;  %s16_s10 = int_to_ptr.vmem [resolvable:$true] %s15_s10 }
   0x4   :  { %p1339_p1 = scmp.lt.u32.totalorder %s1335_s13, %s1722_s0 }
   0x6   :  { %p1341_p2 = pnand %p1339_p1, %p1336_p0 }
   0x8   :  { %1344 = shalt.err (!%p1341_p2)
}
   0x9   :  { %s1345_s18 = scalar_lea.vmem %s16_s10, 1024  ;;  %p1350_p4 = scmp.lt.s32.totalorder %s16_s10, %s16_s10 }
   0xa   :  { %p1346_p3 = scmp.ne.s32.totalorder %s16_s10, %s1345_s18  ;;  %p1351_p5 = scmp.lt.s32.totalorder %s1345_s18, %s1345_s18 }
   0xc   :  { %p1352_p6 = por %p1351_p5, %p1350_p4 }
   0xe   :  { %p1353_p7 = pnand %p1352_p6, %p1346_p3 }
  0x10   :  { %1356 = shalt.err (!%p1353_p7)
}
  0x11   :  { %s1396_s19 = smov 128   ;;  %s1397_s20 = smov 8  }
  0x12   :  { %21 = dma.hbm_to_vmem [thread:$0]  %s1722_s0, 1024, %s16_s10, [#allocation3], %s1396_s19, %s1396_s19, %s1397_s20  }
  0x13   :  { %s1398_s23 = smov [#allocation5]   ;;  %s1357_s27 = scalar_lea.hbm %s1723_s1, 1024 }
  0x14   :  { %s27_s24 = sshll.u32 %s1398_s23, 4  ;;  %p1358_p8 = scmp.ne.s32.totalorder %s1723_s1, %s1357_s27  ;;  %s28_s24 = int_to_ptr.vmem [resolvable:$true] %s27_s24 }
  0x15   :  { %p1361_p9 = scmp.lt.u32.totalorder %s1357_s27, %s1723_s1 }
  0x17   :  { %p1363_p10 = pnand %p1361_p9, %p1358_p8 }
  0x19   :  { %1366 = shalt.err (!%p1363_p10)
}
  0x1a   :  { %s1367_s4 = scalar_lea.vmem %s28_s24, 1024  ;;  %p1372_p12 = scmp.lt.s32.totalorder %s28_s24, %s28_s24 }
  0x1b   :  { %p1368_p11 = scmp.ne.s32.totalorder %s28_s24, %s1367_s4  ;;  %p1373_p13 = scmp.lt.s32.totalorder %s1367_s4, %s1367_s4 }
  0x1d   :  { %p1374_p0 = por %p1373_p13, %p1372_p12 }
  0x1f   :  { %p1375_p1 = pnand %p1374_p0, %p1368_p11 }
  0x21   :  { %1378 = shalt.err (!%p1375_p1)
}
  0x22   :  { %33 = dma.hbm_to_vmem [thread:$0]  %s1723_s1, 1024, %s28_s24, [#allocation6], %s1396_s19, %s1396_s19, %s1397_s20  }
  0x23   :  { %1389 = dma.done.wait [#allocation3], 1024  }
  0x24   :  { %1390 = vsyncadd [#allocation3], 4294966272 }
  0x25   :  { %1391 = dma.done.wait [#allocation6], 1024  }
  0x26   :  { %1392 = vsyncadd [#allocation6], 4294966272  ;;  %v40_v0 = vld [vmem:[#allocation2] sm:$0xff]  ;;  %v41_v1 = vld [vmem:[#allocation2 + $0x8] sm:$0xff]  ;;  %vm185_vm0 = vcmask 1041409   ;;  %vm187_vm1 = vcmask 1042434  }
  0x27   :  { %v42_v2 = vld [vmem:[#allocation2 + $0x10] sm:$0xff]  ;;  %v43_v3 = vld [vmem:[#allocation2 + $0x18] sm:$0xff]  ;;  %v44_v4 = vld [vmem:[#allocation2 + $0x20] sm:$0xff]  ;;  %v56_v6 = vrot.slane %v40_v0, 4  ;;  %v62_v7 = vrot.slane %v41_v1, 4  ;;  %vm189_vm2 = vcmask 1043459  }
  0x28   :  { %v45_v5 = vld [vmem:[#allocation2 + $0x28] sm:$0xff]  ;;  %v68_v8 = vrot.slane %v42_v2, 4  ;;  %v46_v9 = vld [vmem:[#allocation2 + $0x30] sm:$0xff]  ;;  %v47_v10 = vld [vmem:[#allocation2 + $0x38] sm:$0xff]  ;;  %v74_v11 = vrot.slane %v43_v3, 4  ;;  %v80_v12 = vrot.slane %v44_v4, 4 }
  0x29   :  { %v86_v13 = vrot.slane %v45_v5, 4  ;;  %v57_v14 = vadd.f32 %v56_v6, %v40_v0  ;;  %v63_v15 = vadd.f32 %v62_v7, %v41_v1  ;;  %v92_v17 = vrot.slane %v46_v9, 4  ;;  %v1455_v62 = vld [vmem:[#allocation5] sm:$0xff]  ;;  %v1457_v63 = vld [vmem:[#allocation5 + $0x8] sm:$0xff]  ;;  %s1379_s11 = scalar_lea.hbm %s1724_s2, 16 }
  0x2a   :  { %v69_v16 = vadd.f32 %v68_v8, %v42_v2  ;;  %v75_v18 = vadd.f32 %v74_v11, %v43_v3  ;;  %v81_v19 = vadd.f32 %v80_v12, %v44_v4  ;;  %v98_v21 = vrot.slane %v47_v10, 4  ;;  %v1467_v4 = vld [vmem:[#allocation5 + $0x10] sm:$0xff]  ;;  %p1380_p2 = scmp.ne.s32.totalorder %s1724_s2, %s1379_s11  ;;  %p1383_p3 = scmp.lt.u32.totalorder %s1379_s11, %s1724_s2 }
  0x2b   :  { %v87_v20 = vadd.f32 %v86_v13, %v45_v5  ;;  %v58_v22 = vrot.slane %v57_v14, 2  ;;  %v64_v23 = vrot.slane %v63_v15, 2  ;;  %v93_v25 = vadd.f32 %v92_v17, %v46_v9  ;;  %v1469_v5 = vld [vmem:[#allocation5 + $0x18] sm:$0xff]  ;;  %v1484_v13 = vld [vmem:[#allocation5 + $0x28] sm:$0xff] }
  0x2c   :  { %v70_v24 = vrot.slane %v69_v16, 2  ;;  %v76_v26 = vrot.slane %v75_v18, 2  ;;  %v82_v27 = vrot.slane %v81_v19, 2  ;;  %v99_v29 = vadd.f32 %v98_v21, %v47_v10  ;;  %v1479_v10 = vld [vmem:[#allocation5 + $0x20] sm:$0xff]  ;;  %p1385_p4 = pnand %p1383_p3, %p1380_p2 }
  0x2d   :  { %v88_v28 = vrot.slane %v87_v20, 2  ;;  %v59_v30 = vadd.f32 %v58_v22, %v57_v14  ;;  %v65_v31 = vadd.f32 %v64_v23, %v63_v15  ;;  %v94_v33 = vrot.slane %v93_v25, 2 }
  0x2e   :  { %v71_v32 = vadd.f32 %v70_v24, %v69_v16  ;;  %v77_v34 = vadd.f32 %v76_v26, %v75_v18  ;;  %v83_v35 = vadd.f32 %v82_v27, %v81_v19  ;;  %v100_v37 = vrot.slane %v99_v29, 2 }
  0x2f   :  { %v89_v36 = vadd.f32 %v88_v28, %v87_v20  ;;  %v60_v38 = vrot.slane %v59_v30, 1  ;;  %v66_v39 = vrot.slane %v65_v31, 1  ;;  %v95_v41 = vadd.f32 %v94_v33, %v93_v25 }
  0x30   :  { %v72_v40 = vrot.slane %v71_v32, 1  ;;  %vm191_vm3 = vcmask 1044484   ;;  %v78_v42 = vrot.slane %v77_v34, 1  ;;  %v84_v43 = vrot.slane %v83_v35, 1 }
  0x31   :  { %v90_v44 = vrot.slane %v89_v36, 1  ;;  %v101_v45 = vadd.f32 %v100_v37, %v99_v29  ;;  %vm193_vm4 = vcmask 1045509   ;;  %v61_v46 = vadd.f32 %v60_v38, %v59_v30  ;;  %v1502_v29 = vld [vmem:[#allocation5 + $0x30] sm:$0xff] }
  0x32   :  { %v67_v47 = vadd.f32 %v66_v39, %v65_v31  ;;  %v73_v48 = vadd.f32 %v72_v40, %v71_v32  ;;  %v96_v49 = vrot.slane %v95_v41, 1  ;;  %vm195_vm5 = vcmask 1046534  }
  0x33   :  { %v79_v50 = vadd.f32 %v78_v42, %v77_v34  ;;  %v85_v51 = vadd.f32 %v84_v43, %v83_v35  ;;  %v91_v52 = vadd.f32 %v90_v44, %v89_v36  ;;  %v102_v53 = vrot.slane %v101_v45, 1  ;;  %v1506_v34 = vld [vmem:[#allocation5 + $0x38] sm:$0xff] }
  0x34   :  { %vm197_vm6 = vcmask 1047559   ;;  %v97_v54 = vadd.f32 %v96_v49, %v95_v41  ;;  %v1443_v55 = vmul.f32 0.125, %v61_v46  ;;  %v1445_v56 = vmul.f32 0.125, %v67_v47 }
  0x35   :  { %v1447_v57 = vmul.f32 0.125, %v73_v48  ;;  %v103_v58 = vadd.f32 %v102_v53, %v101_v45  ;;  %v1449_v59 = vmul.f32 0.125, %v79_v50  ;;  %v1451_v60 = vmul.f32 0.125, %v85_v51 }
  0x36   :  { %v1453_v61 = vmul.f32 0.125, %v91_v52  ;;  %v1459_v0 = vmul.f32 0.125, %v97_v54  ;;  %v169_v1 = vmul.f32 %v1443_v55, %v1443_v55  ;;  %v170_v2 = vmul.f32 %v1445_v56, %v1445_v56 }
  0x37   :  { %v171_v3 = vmul.f32 %v1447_v57, %v1447_v57  ;;  %v1471_v6 = vmul.f32 0.125, %v103_v58  ;;  %v172_v7 = vmul.f32 %v1449_v59, %v1449_v59  ;;  %v173_v8 = vmul.f32 %v1451_v60, %v1451_v60 }
  0x38   :  { %v174_v9 = vmul.f32 %v1453_v61, %v1453_v61  ;;  %v175_v11 = vmul.f32 %v1459_v0, %v1459_v0  ;;  %v186_v12 = vsel %vm185_vm0, %v170_v2, %v169_v1  ;;  %v113_v14 = vrot.slane %v1455_v62, 4 }
  0x39   :  { %v119_v15 = vrot.slane %v1457_v63, 4  ;;  %v176_v16 = vmul.f32 %v1471_v6, %v1471_v6  ;;  %v188_v17 = vsel %vm187_vm1, %v171_v3, %v186_v12  ;;  %v125_v18 = vrot.slane %v1467_v4, 4 }
  0x3a   :  { %v131_v19 = vrot.slane %v1469_v5, 4  ;;  %v190_v20 = vsel %vm189_vm2, %v172_v7, %v188_v17  ;;  %v114_v21 = vadd.f32 %v113_v14, %v1455_v62  ;;  %v137_v23 = vrot.slane %v1479_v10, 4 }
  0x3b   :  { %v120_v22 = vadd.f32 %v119_v15, %v1457_v63  ;;  %v192_v24 = vsel %vm191_vm3, %v173_v8, %v190_v20  ;;  %v126_v25 = vadd.f32 %v125_v18, %v1467_v4  ;;  %v143_v27 = vrot.slane %v1484_v13, 4 }
  0x3c   :  { %v132_v26 = vadd.f32 %v131_v19, %v1469_v5  ;;  %v194_v28 = vsel %vm193_vm4, %v174_v9, %v192_v24  ;;  %v115_v30 = vrot.slane %v114_v21, 2  ;;  %v138_v32 = vadd.f32 %v137_v23, %v1479_v10 }
  0x3d   :  { %v121_v31 = vrot.slane %v120_v22, 2  ;;  %v196_v33 = vsel %vm195_vm5, %v175_v11, %v194_v28  ;;  %v127_v35 = vrot.slane %v126_v25, 2  ;;  %v144_v37 = vadd.f32 %v143_v27, %v1484_v13 }
  0x3e   :  { %v133_v36 = vrot.slane %v132_v26, 2  ;;  %v198_v38 = vsel %vm197_vm6, %v176_v16, %v196_v33  ;;  %v116_v39 = vadd.f32 %v115_v30, %v114_v21  ;;  %v139_v41 = vrot.slane %v138_v32, 2 }
  0x3f   :  { %v122_v40 = vadd.f32 %v121_v31, %v120_v22  ;;  %200 = vadd.xlane.f32.xlu0 %v198_v38  ;;  %v128_v42 = vadd.f32 %v127_v35, %v126_v25  ;;  %v145_v44 = vrot.slane %v144_v37, 2  ;;  %v149_v45 = vrot.slane %v1502_v29, 4 }
  0x40   :  { %v134_v43 = vadd.f32 %v133_v36, %v132_v26  ;;  %v117_v46 = vrot.slane %v116_v39, 1  ;;  %v140_v48 = vadd.f32 %v139_v41, %v138_v32  ;;  %v155_v49 = vrot.slane %v1506_v34, 4 }
  0x41   :  { %v123_v47 = vrot.slane %v122_v40, 1  ;;  %v129_v50 = vrot.slane %v128_v42, 1  ;;  %v146_v52 = vadd.f32 %v145_v44, %v144_v37  ;;  %v150_v53 = vadd.f32 %v149_v45, %v1502_v29 }
  0x42   :  { %v135_v51 = vrot.slane %v134_v43, 1  ;;  %v118_v54 = vadd.f32 %v117_v46, %v116_v39  ;;  %v141_v1 = vrot.slane %v140_v48, 1  ;;  %v156_v2 = vadd.f32 %v155_v49, %v1506_v34 }
  0x43   :  { %v124_v58 = vadd.f32 %v123_v47, %v122_v40  ;;  %v130_v3 = vadd.f32 %v129_v50, %v128_v42  ;;  %v147_v8 = vrot.slane %v146_v52, 1  ;;  %v151_v9 = vrot.slane %v150_v53, 2 }
  0x44   :  { %v136_v7 = vadd.f32 %v135_v51, %v134_v43  ;;  %v142_v11 = vadd.f32 %v141_v1, %v140_v48  ;;  %v157_v12 = vrot.slane %v156_v2, 2  ;;  %v1514_v14 = vmul.f32 0.125, %v118_v54 }
  0x45   :  { %v1516_v15 = vmul.f32 0.125, %v124_v58  ;;  %v148_v16 = vadd.f32 %v147_v8, %v146_v52  ;;  %v152_v17 = vadd.f32 %v151_v9, %v150_v53  ;;  %v1518_v18 = vmul.f32 0.125, %v130_v3 }
  0x46   :  { %v1520_v19 = vmul.f32 0.125, %v136_v7  ;;  %v158_v20 = vadd.f32 %v157_v12, %v156_v2  ;;  %v1522_v21 = vmul.f32 0.125, %v142_v11  ;;  %v228_v22 = vmul.f32 %v1514_v14, %v1514_v14 }
  0x47   :  { %v229_v23 = vmul.f32 %v1516_v15, %v1516_v15  ;;  %v153_v24 = vrot.slane %v152_v17, 1  ;;  %v1528_v25 = vmul.f32 0.125, %v148_v16  ;;  %v230_v26 = vmul.f32 %v1518_v18, %v1518_v18 }
  0x48   :  { %v231_v27 = vmul.f32 %v1520_v19, %v1520_v19  ;;  %v159_v28 = vrot.slane %v158_v20, 1  ;;  %v232_v30 = vmul.f32 %v1522_v21, %v1522_v21  ;;  %v351_v46 = vmul.f32 %v1455_v62, %v1455_v62 }
  0x49   :  { %v244_v31 = vsel %vm185_vm0, %v229_v23, %v228_v22  ;;  %v154_v32 = vadd.f32 %v153_v24, %v152_v17  ;;  %v233_v33 = vmul.f32 %v1528_v25, %v1528_v25  ;;  %v1399_v47 = vmov 0.0  }
  0x4a   :  { %v245_v35 = vsel %vm187_vm1, %v230_v26, %v244_v31  ;;  %v160_v36 = vadd.f32 %v159_v28, %v158_v20  ;;  %1241 = vmatprep.subr.mxu0 %v1399_v47  ;;  %1246 = vmatprep.subr.mxu1 %v1399_v47  ;;  %v355_v48 = vmul.f32 %v1479_v10, %v1479_v10  ;;  %vm1400_vm7 = vmmov 0  }
  0x4b   :  { %v246_v37 = vsel %vm189_vm2, %v231_v27, %v245_v35  ;;  %v1541_v38 = vmul.f32 0.125, %v154_v32  ;;  %1242 = vmatpush3.xpose.msra.mxu0 %v1455_v62  ;;  %1247 = vmatpush3.xpose.msra.mxu1 %v1457_v63  ;;  %v396_v49 = vlaneseq  ;;  %v357_v51 = vmul.f32 %v1502_v29, %v1502_v29 }
  0x4c   :  { %v247_v39 = vsel %vm191_vm3, %v232_v30, %v246_v37  ;;  %v1544_v40 = vmul.f32 0.125, %v160_v36  ;;  %1243 = vmatprep.mubr.msk.f32.mxu0 %vm1400_vm7, %v1399_v47  ;;  %1251 = vmatprep.subr.mxu0 %v1399_v47  ;;  %v352_v53 = vmul.f32 %v1457_v63, %v1457_v63  ;;  %v353_v54 = vmul.f32 %v1467_v4, %v1467_v4 }
  0x4d   :  { %v248_v41 = vsel %vm193_vm4, %v233_v33, %v247_v39  ;;  %v234_v42 = vmul.f32 %v1541_v38, %v1541_v38  ;;  %1248 = vmatprep.mubr.msk.f32.mxu1 %vm1400_vm7, %v1399_v47  ;;  %1256 = vmatprep.subr.mxu1 %v1399_v47  ;;  %v397_v50 = vshrl.u32 %v396_v49, 7  ;;  %v1018_v62 = vand.u32 127, %v396_v49 }
  0x4e   :  { %v235_v43 = vmul.f32 %v1544_v40, %v1544_v40  ;;  %361 = vadd.xlane.f32.xlu1 %v352_v53  ;;  %v354_v58 = vmul.f32 %v1469_v5, %v1469_v5  ;;  %v356_v1 = vmul.f32 %v1484_v13, %v1484_v13  ;;  %v358_v2 = vmul.f32 %v1506_v34, %v1506_v34 }
  0x4f   :  { %v249_v44 = vsel %vm195_vm5, %v234_v42, %v248_v41  ;;  %v1569_v52 = vsub.s32 %v1018_v62, %v397_v50  ;;  %v1401_v63 = vmov 1966171168   ;;  %vm337_vm8 = vcmask 1041408  }
  0x50   :  { %v250_v45 = vsel %vm197_vm6, %v235_v43, %v249_v44  ;;  %v394_v8 = vunpack.c.l.s4 %v1401_v63  ;;  %vm339_vm9 = vcmask 1043456   ;;  %vm341_vm10 = vcmask 1045504  }
  0x51   :  { %252 = vadd.xlane.f32.xlu0 %v250_v45  ;;  %vm1098_vm11 = vcmask 64512   ;;  %vm1180_vm12 = vcmask 3072  }
  0x52   :  { %363 = vadd.xlane.f32.xlu1 %v353_v54  ;;  %v395_v30 = vunpack.c.0.s8 %v394_v8 }
  0x54   :  { %v398_v41 = vsub.s32 %v395_v30, %v397_v50 }
  0x55   :  { %359 = vadd.xlane.f32.xlu0 %v351_v46 }
  0x56   :  { %365 = vadd.xlane.f32.xlu1 %v354_v58 }
  0x59   :  { %367 = vadd.xlane.f32.xlu0 %v355_v48 }
  0x5a   :  { %369 = vadd.xlane.f32.xlu1 %v356_v1 }
  0x5d   :  { %371 = vadd.xlane.f32.xlu0 %v357_v51 }
  0x5e   :  { %373 = vadd.xlane.f32.xlu1 %v358_v2 }
  0xcc   :  { %v201_v3 = vpop.xlane.xlu0 %200 }
  0xcd   :  { %v202_v7 = vmax.f32 %v201_v3, 1e-24 }
  0xcf   :  { %1295 = vrsqrt.f32 %v202_v7 }
  0xd9   :  { %v1296_v9 = vpop.eup %1295 }
  0xda   :  { %v205_v11 = vrot.slane %v1296_v9, 1  ;;  %v206_v12 = vrot.slane %v1296_v9, 2  ;;  %v207_v16 = vrot.slane %v1296_v9, 3  ;;  %v208_v17 = vrot.slane %v1296_v9, 4 }
  0xdb   :  { %v209_v20 = vrot.slane %v1296_v9, 5  ;;  %v210_v22 = vrot.slane %v1296_v9, 6  ;;  %v211_v23 = vrot.slane %v1296_v9, 7  ;;  %v1582_v24 = vmul.f32 %v1296_v9, %v1443_v55 }
  0xdc   :  { %v1585_v26 = vmul.f32 %v205_v11, %v1445_v56  ;;  %v1588_v27 = vmul.f32 %v207_v16, %v1449_v59  ;;  %v1591_v28 = vmul.f32 %v208_v17, %v1451_v60  ;;  %v1594_v31 = vmul.f32 %v206_v12, %v1447_v57 }
  0xdd   :  { %v1597_v32 = vmul.f32 %v209_v20, %v1453_v61  ;;  %v1600_v33 = vmul.f32 %v210_v22, %v1459_v0  ;;  %v1603_v55 = vmul.f32 %v211_v23, %v1471_v6  ;;  %v321_v35 = vrot.slane %v1582_v24, 6 }
  0xde   :  { %v253_v56 = vpop.xlane.xlu0 %252  ;;  %v316_v59 = vrot.slane %v1588_v27, 7  ;;  %v322_v60 = vrot.slane %v1585_v26, 5  ;;  %v333_v36 = vrot.slane %v1591_v28, 2 }
  0xdf   :  { %v254_v57 = vmax.f32 %v253_v56, 1e-24  ;;  %v327_v37 = vrot.slane %v1600_v33, 4  ;;  %v328_v61 = vrot.slane %v1603_v55, 3  ;;  %v334_v0 = vrot.slane %v1597_v32, 1 }
  0xe0   :  { %v317_v6 = vsel %vm185_vm0, %v316_v59, %v1594_v31  ;;  %v323_v39 = vsel %vm189_vm2, %v322_v60, %v321_v35 }
  0xe1   :  { %1297 = vrsqrt.f32 %v254_v57  ;;  %v329_v42 = vsel %vm193_vm4, %v328_v61, %v327_v37  ;;  %v338_v43 = vsel %vm337_vm8, %v317_v6, %v323_v39  ;;  %v335_v44 = vsel %vm197_vm6, %v334_v0, %v333_v36 }
  0xe2   :  { %v340_v45 = vsel %vm339_vm9, %v338_v43, %v329_v42  ;;  %v360_v61 = vpop.xlane.xlu0 %359 }
  0xe3   :  { %v342_v46 = vsel %vm341_vm10, %v340_v45, %v335_v44  ;;  %v375_v0 = vmax.f32 %v360_v61, 1e-24 }
  0xe4   :  { %v392_v48 = vcombine.high %v342_v46, %v342_v46  ;;  %v399_v49 = vrot.slane %v342_v46, %v398_v41 }
  0xe5   :  { %1299 = vrsqrt.f32 %v375_v0 }
  0xe6   :  { %v415_v62 = vrot.slane %v399_v49, %v398_v41  ;;  %v407_v51 = vcombine.high %v399_v49, %v399_v49  ;;  %v406_v53 = vrot.slane %v392_v48, %v398_v41  ;;  %v368_v42 = vpop.xlane.xlu0 %367 }
  0xe7   :  { %v379_v45 = vmax.f32 %v368_v42, 1e-24 }
  0xe8   :  { %1244 = vmatmul.mubr.f32.vlgmr.msra.gmra.mrb[0].mxu0 %v415_v62  ;;  %v429_v54 = vrot.slane %v407_v51, %v398_v41  ;;  %v437_v50 = vcombine.high %v415_v62, %v415_v62  ;;  %v422_v2 = vrot.slane %v406_v53, %v398_v41  ;;  %v408_v3 = vcombine.high %v406_v53, %v406_v53 }
  0xe9   :  { %1252 = vmatpush3.xpose.msra.mxu0 %v1467_v4  ;;  %1253 = vmatprep.mubr.msk.f32.mxu0 %vm1400_vm7, %v1399_v47 }
  0xea   :  { %1249 = vmatmul.mubr.f32.vlgmr.msra.gmra.mrb[0].mxu1 %v429_v54  ;;  %1261 = vmatprep.subr.mxu0 %v1399_v47  ;;  %v439_v1 = vcombine.high %v429_v54, %v429_v54  ;;  %v372_v48 = vpop.xlane.xlu0 %371 }
  0xeb   :  { %v1298_v58 = vpop.eup %1297  ;;  %1257 = vmatpush3.xpose.msra.mxu1 %v1469_v5  ;;  %1258 = vmatprep.mubr.msk.f32.mxu1 %vm1400_vm7, %v1399_v47  ;;  %v381_v62 = vmax.f32 %v372_v48, 1e-24 }
  0xec   :  { %1254 = vmatmul.mubr.f32.vlgmr.msra.gmra.mrb[2].mxu0 %v437_v50  ;;  %1266 = vmatprep.subr.mxu1 %v1399_v47  ;;  %v257_v4 = vrot.slane %v1298_v58, 1  ;;  %v258_v7 = vrot.slane %v1298_v58, 2  ;;  %v259_v63 = vrot.slane %v1298_v58, 3  ;;  %v260_v8 = vrot.slane %v1298_v58, 4 }
  0xed   :  { %1262 = vmatpush3.xpose.msra.mxu0 %v1479_v10  ;;  %v261_v9 = vrot.slane %v1298_v58, 5  ;;  %v262_v11 = vrot.slane %v1298_v58, 6  ;;  %v263_v12 = vrot.slane %v1298_v58, 7  ;;  %v272_v16 = vmul.f32 %v1298_v58, %v1514_v14  ;;  %1263 = vmatprep.mubr.msk.f32.mxu0 %vm1400_vm7, %v1399_v47 }
  0xee   :  { %v273_v5 = vmul.f32 %v257_v4, %v1516_v15  ;;  %v274_v17 = vmul.f32 %v258_v7, %v1518_v18  ;;  %v275_v20 = vmul.f32 %v259_v63, %v1520_v19  ;;  %v276_v22 = vmul.f32 %v260_v8, %v1522_v21  ;;  %1259 = vmatmul.mubr.f32.vlgmr.msra.gmra.mrb[2].mxu1 %v439_v1 }
  0xef   :  { %v277_v23 = vmul.f32 %v261_v9, %v1528_v25  ;;  %v278_v10 = vmul.f32 %v262_v11, %v1541_v38  ;;  %1267 = vmatpush3.xpose.msra.mxu1 %v1484_v13  ;;  %v279_v14 = vmul.f32 %v263_v12, %v1544_v40  ;;  %1271 = vmatprep.subr.mxu0 %v1399_v47  ;;  %v1300_v51 = vpop.eup %1299 }
  0xf0   :  { %v281_v30 = vmul.f32 %v273_v5, %v1585_v26  ;;  %v282_v56 = vmul.f32 %v274_v17, %v1594_v31  ;;  %v283_v15 = vmul.f32 %v275_v20, %v1588_v27  ;;  %1264 = vmatmul.mubr.f32.vlgmr.msra.gmra.mrb[4].mxu0 %v422_v2  ;;  %v284_v18 = vmul.f32 %v276_v22, %v1591_v28 }
  0xf1   :  { %1268 = vmatprep.mubr.msk.f32.mxu1 %vm1400_vm7, %v1399_v47  ;;  %v436_v19 = vrot.slane %v408_v3, %v398_v41  ;;  %v280_v21 = vmul.f32 %v272_v16, %v1582_v24  ;;  %v285_v13 = vmul.f32 %v277_v23, %v1597_v32  ;;  %1272 = vmatpush3.xpose.msra.mxu0 %v1502_v29 }
  0xf2   :  { %v296_v25 = vrot.slane %v281_v30, 7  ;;  %v298_v38 = vrot.slane %v282_v56, 6  ;;  %1276 = vmatprep.subr.mxu1 %v1399_v47  ;;  %v286_v40 = vmul.f32 %v278_v10, %v1600_v33  ;;  %1273 = vmatprep.mubr.msk.f32.mxu0 %vm1400_vm7, %v1399_v47  ;;  %v438_v26 = vcombine.high %v422_v2, %v422_v2 }
  0xf3   :  { %1269 = vmatmul.mubr.f32.vlgmr.msra.gmra.mrb[4].mxu1 %v436_v19  ;;  %v287_v27 = vmul.f32 %v279_v14, %v1603_v55  ;;  %v300_v24 = vrot.slane %v283_v15, 5  ;;  %v302_v31 = vrot.slane %v284_v18, 4  ;;  %v440_v32 = vcombine.high %v436_v19, %v436_v19 }
  0xf4   :  { %v297_v28 = vsel %vm185_vm0, %v296_v25, %v280_v21  ;;  %1277 = vmatpush3.xpose.msra.mxu1 %v1506_v34  ;;  %1278 = vmatprep.mubr.msk.f32.mxu1 %vm1400_vm7, %v1399_v47  ;;  %v304_v59 = vrot.slane %v285_v13, 3  ;;  %v306_v60 = vrot.slane %v286_v40, 2  ;;  %v362_v47 = vpop.xlane.xlu1 %361  ;;  %v1022_v54 = vrot.slane %v1300_v51, %v1569_v52 }
  0xf5   :  { %v299_v29 = vsel %vm187_vm1, %v298_v38, %v297_v28  ;;  %1274 = vmatmul.mubr.f32.vlgmr.msra.gmra.mrb[6].mxu0 %v438_v26  ;;  %v308_v36 = vrot.slane %v287_v27, 1  ;;  %v376_v39 = vmax.f32 %v362_v47, 1e-24  ;;  %v1402_v51 = vmov 0  }
  0xf6   :  { %v301_v33 = vsel %vm189_vm2, %v300_v24, %v299_v29  ;;  %1294 = vset.pattern.permute.xlu0 %v1402_v51 }
  0xf7   :  { %v303_v35 = vsel %vm191_vm3, %v302_v31, %v301_v33  ;;  %1279 = vmatmul.mubr.f32.vlgmr.msra.gmra.mrb[6].mxu1 %v440_v32  ;;  %1301 = vrsqrt.f32 %v376_v39 }
  0xf8   :  { %v305_v55 = vsel %vm193_vm4, %v304_v59, %v303_v35  ;;  %v364_v37 = vpop.xlane.xlu1 %363 }
  0xf9   :  { %v307_v34 = vsel %vm195_vm5, %v306_v60, %v305_v55  ;;  %v377_v41 = vmax.f32 %v364_v37, 1e-24 }
  0xfa   :  { %v309_v57 = vsel %vm197_vm6, %v308_v36, %v307_v34 }
  0xfb   :  { %311 = vadd.xlane.f32.xlu0 %v309_v57  ;;  %1303 = vrsqrt.f32 %v377_v41 }
  0xfc   :  { %v366_v6 = vpop.xlane.xlu1 %365 }
  0xfd   :  { %v378_v43 = vmax.f32 %v366_v6, 1e-24 }
  0xff   :  { %1305 = vrsqrt.f32 %v378_v43 }
 0x100   :  { %v370_v44 = vpop.xlane.xlu1 %369  ;;  %1307 = vrsqrt.f32 %v379_v45 }
 0x101   :  { %v380_v46 = vmax.f32 %v370_v44, 1e-24  ;;  %v1302_v50 = vpop.eup %1301 }
 0x102   :  { %v1026_v7 = vrot.slane %v1302_v50, %v1569_v52 }
 0x103   :  { %1309 = vrsqrt.f32 %v380_v46 }
 0x104   :  { %v374_v49 = vpop.xlane.xlu1 %373  ;;  %1311 = vrsqrt.f32 %v381_v62 }
 0x105   :  { %v382_v53 = vmax.f32 %v374_v49, 1e-24  ;;  %v1304_v58 = vpop.eup %1303 }
 0x106   :  { %v1030_v12 = vrot.slane %v1304_v58, %v1569_v52 }
 0x107   :  { %1313 = vrsqrt.f32 %v382_v53 }
 0x109   :  { %v1306_v1 = vpop.eup %1305 }
 0x10a   :  { %v1308_v63 = vpop.eup %1307  ;;  %v1034_v16 = vrot.slane %v1306_v1, %v1569_v52 }
 0x10b   :  { %v1038_v10 = vrot.slane %v1308_v63, %v1569_v52 }
 0x10d   :  { %v1310_v17 = vpop.eup %1309 }
 0x10e   :  { %v1312_v30 = vpop.eup %1311  ;;  %v1042_v25 = vrot.slane %v1310_v17, %v1569_v52 }
 0x10f   :  { %v1046_v29 = vrot.slane %v1312_v30, %v1569_v52 }
 0x111   :  { %v1314_v38 = vpop.eup %1313 }
 0x112   :  { %v1050_v55 = vrot.slane %v1314_v38, %v1569_v52 }
 0x188   :  { %v312_v53 = vpop.xlane.xlu0 %311 }
 0x1bb   :  { %v515_v2 = vpop.f32.mrb[0].mxu0 }
 0x1bc   :  { %v1059_v3 = vmul.f32 %v1022_v54, %v515_v2  ;;  %v1245_v4 = vpop.f32.mrb[1].mxu0  ;;  %v313_v54 = vmul.f32 14.285714, %v312_v53 }
 0x1bd   :  { %v585_v8 = vpop.f32.mrb[0].mxu1 }
 0x1be   :  { %v1060_v9 = vmul.f32 %v1026_v7, %v585_v8  ;;  %v1250_v11 = vpop.f32.mrb[1].mxu1  ;;  %v1672_v56 = vmul.f32 14.285714, %v1059_v3  ;;  %v344_v50 = vrot.slane %v313_v54, 2  ;;  %v346_v58 = vrot.slane %v313_v54, 6 }
 0x1bf   :  { %v655_v5 = vpop.f32.mrb[2].mxu0 }
 0x1c0   :  { %v1669_v20 = vmul.f32 14.285714, %v1060_v9  ;;  %v1061_v22 = vmul.f32 %v1030_v12, %v655_v5  ;;  %v1255_v23 = vpop.f32.mrb[3].mxu0  ;;  %v348_v1 = vsel %vm337_vm8, %v344_v50, %v346_v58 }
 0x1c1   :  { %v725_v14 = vpop.f32.mrb[2].mxu1  ;;  %v349_v2 = vsel %vm339_vm9, %v348_v1, %v344_v50 }
 0x1c2   :  { %v1083_v15 = vrot.slane %v1669_v20, 7  ;;  %v1069_v18 = vmul.f32 14.285714, %v1061_v22  ;;  %v1062_v19 = vmul.f32 %v1034_v16, %v725_v14  ;;  %v1260_v21 = vpop.f32.mrb[3].mxu1  ;;  %v1690_v4 = vsel %vm341_vm10, %v349_v2, %v346_v58 }
 0x1c3   :  { %v795_v13 = vpop.f32.mrb[4].mxu0 }
 0x1c4   :  { %v1084_v40 = vsel %vm185_vm0, %v1083_v15, %v1672_v56  ;;  %v1085_v26 = vrot.slane %v1069_v18, 6  ;;  %v1070_v27 = vmul.f32 14.285714, %v1062_v19  ;;  %v1063_v28 = vmul.f32 %v1038_v10, %v795_v13  ;;  %v1265_v24 = vpop.f32.mrb[5].mxu0 }
 0x1c6   :  { %v1086_v31 = vsel %vm187_vm1, %v1085_v26, %v1084_v40  ;;  %v1087_v32 = vrot.slane %v1070_v27, 5  ;;  %v1071_v33 = vmul.f32 14.285714, %v1063_v28  ;;  %v865_v59 = vpop.f32.mrb[4].mxu1 }
 0x1c7   :  { %v1064_v35 = vmul.f32 %v1042_v25, %v865_v59  ;;  %v1270_v60 = vpop.f32.mrb[5].mxu1 }
 0x1c8   :  { %v1088_v36 = vsel %vm189_vm2, %v1087_v32, %v1086_v31  ;;  %v1089_v34 = vrot.slane %v1071_v33, 4  ;;  %v935_v57 = vpop.f32.mrb[6].mxu0 }
 0x1c9   :  { %v1072_v47 = vmul.f32 14.285714, %v1064_v35  ;;  %v1065_v37 = vmul.f32 %v1046_v29, %v935_v57  ;;  %v1275_v61 = vpop.f32.mrb[7].mxu0 }
 0x1ca   :  { %v1090_v0 = vsel %vm191_vm3, %v1089_v34, %v1088_v36  ;;  %v1005_v6 = vpop.f32.mrb[6].mxu1 }
 0x1cb   :  { %v1091_v39 = vrot.slane %v1072_v47, 3  ;;  %v1073_v41 = vmul.f32 14.285714, %v1065_v37  ;;  %v1066_v42 = vmul.f32 %v1050_v55, %v1005_v6  ;;  %v1280_v43 = vpop.f32.mrb[7].mxu1 }
 0x1cd   :  { %v1093_v44 = vrot.slane %v1073_v41, 2  ;;  %v1074_v45 = vmul.f32 14.285714, %v1066_v42  ;;  %v1092_v46 = vsel %vm193_vm4, %v1091_v39, %v1090_v0 }
 0x1cf   :  { %v1095_v48 = vrot.slane %v1074_v45, 1  ;;  %v1094_v52 = vsel %vm195_vm5, %v1093_v44, %v1092_v46 }
 0x1d1   :  { %v1096_v49 = vsel %vm197_vm6, %v1095_v48, %v1094_v52 }
 0x1d2   :  { %v1099_v62 = vsel %vm1098_vm11, %v1096_v49, -inf }
 0x1d3   :  { %1100 = vmax.xlane.f32.xlu1 %v1099_v62 }
 0x260   :  { %v1101_v3 = vpop.xlane.xlu1 %1100 }
 0x261   :  { %v1693_v7 = vmax.f32 %v1690_v4, %v1101_v3 }
 0x263   :  { %1108 = vperm.xlu0 %1294, %v1693_v7   ;;  %v1103_v44 = vsub.f32 %v1690_v4, %v1693_v7 }
 0x2e2   :  { %v1109_v63 = vpop.permute.xlu0 %1108 }
 0x2e3   :  { %v1110_v8 = vrot.slane %v1109_v63, 1  ;;  %v1111_v9 = vrot.slane %v1109_v63, 2  ;;  %v1112_v11 = vrot.slane %v1109_v63, 3  ;;  %v1113_v12 = vrot.slane %v1109_v63, 4 }
 0x2e4   :  { %v1114_v16 = vrot.slane %v1109_v63, 5  ;;  %v1125_v5 = vsub.f32 %v1672_v56, %v1109_v63  ;;  %v1115_v17 = vrot.slane %v1109_v63, 6  ;;  %v1116_v22 = vrot.slane %v1109_v63, 7 }
 0x2e5   :  { %v1126_v23 = vsub.f32 %v1669_v20, %v1110_v8  ;;  %v1127_v10 = vsub.f32 %v1069_v18, %v1111_v9  ;;  %v1128_v14 = vsub.f32 %v1070_v27, %v1112_v11  ;;  %v1129_v30 = vsub.f32 %v1071_v33, %v1113_v12 }
 0x2e6   :  { %v1133_v15 = vmul.f32 1.442695, %v1125_v5  ;;  %v1130_v19 = vsub.f32 %v1072_v47, %v1114_v16  ;;  %v1131_v21 = vsub.f32 %v1073_v41, %v1115_v17  ;;  %v1132_v40 = vsub.f32 %v1074_v45, %v1116_v22 }
 0x2e7   :  { %v1135_v13 = vmul.f32 1.442695, %v1126_v23  ;;  %v1137_v25 = vmul.f32 1.442695, %v1127_v10  ;;  %v1139_v38 = vmul.f32 1.442695, %v1128_v14 }
 0x2e8   :  { %1315 = vpow2.f32 %v1133_v15  ;;  %v1141_v26 = vmul.f32 1.442695, %v1129_v30  ;;  %v1143_v28 = vmul.f32 1.442695, %v1130_v19  ;;  %v1145_v56 = vmul.f32 1.442695, %v1131_v21 }
 0x2e9   :  { %1317 = vpow2.f32 %v1135_v13  ;;  %v1147_v24 = vmul.f32 1.442695, %v1132_v40  ;;  %v1104_v45 = vmul.f32 1.442695, %v1103_v44 }
 0x2ea   :  { %1319 = vpow2.f32 %v1137_v25 }
 0x2eb   :  { %1321 = vpow2.f32 %v1139_v38 }
 0x2ec   :  { %1323 = vpow2.f32 %v1141_v26 }
 0x2ed   :  { %1325 = vpow2.f32 %v1143_v28 }
 0x2ee   :  { %1327 = vpow2.f32 %v1145_v56 }
 0x2ef   :  { %1329 = vpow2.f32 %v1147_v24 }
 0x2f0   :  { %1331 = vpow2.f32 %v1104_v45 }
 0x2f2   :  { %v1316_v20 = vpop.eup %1315 }
 0x2f3   :  { %v1318_v18 = vpop.eup %1317 }
 0x2f4   :  { %v1320_v27 = vpop.eup %1319  ;;  %v1157_v29 = vrot.slane %v1318_v18, 7 }
 0x2f5   :  { %v1322_v31 = vpop.eup %1321  ;;  %v1159_v32 = vrot.slane %v1320_v27, 6 }
 0x2f6   :  { %v1324_v33 = vpop.eup %1323  ;;  %v1158_v59 = vsel %vm185_vm0, %v1157_v29, %v1316_v20  ;;  %v1161_v35 = vrot.slane %v1322_v31, 5 }
 0x2f7   :  { %v1326_v60 = vpop.eup %1325  ;;  %v1160_v55 = vsel %vm187_vm1, %v1159_v32, %v1158_v59  ;;  %v1163_v36 = vrot.slane %v1324_v33, 4 }
 0x2f8   :  { %v1328_v34 = vpop.eup %1327  ;;  %v1162_v57 = vsel %vm189_vm2, %v1161_v35, %v1160_v55  ;;  %v1165_v47 = vrot.slane %v1326_v60, 3 }
 0x2f9   :  { %v1330_v37 = vpop.eup %1329  ;;  %v1164_v61 = vsel %vm191_vm3, %v1163_v36, %v1162_v57  ;;  %v1167_v0 = vrot.slane %v1328_v34, 2 }
 0x2fa   :  { %v1166_v6 = vsel %vm193_vm4, %v1165_v47, %v1164_v61  ;;  %v1169_v39 = vrot.slane %v1330_v37, 1  ;;  %v1332_v46 = vpop.eup %1331 }
 0x2fb   :  { %v1168_v41 = vsel %vm195_vm5, %v1167_v0, %v1166_v6 }
 0x2fc   :  { %v1170_v42 = vsel %vm197_vm6, %v1169_v39, %v1168_v41 }
 0x2fd   :  { %v1172_v43 = vsel %vm1098_vm11, %v1170_v42, 0.0 }
 0x2fe   :  { %1173 = vadd.xlane.f32.xlu1 %v1172_v43 }
 0x38b   :  { %v1174_v48 = vpop.xlane.xlu1 %1173 }
 0x38c   :  { %v1175_v52 = vadd.f32 %v1332_v46, %v1174_v48 }
 0x38e   :  { %1333 = vlog2.f32 %v1175_v52 }
 0x398   :  { %v1334_v49 = vpop.eup %1333 }
 0x399   :  { %v1177_v62 = vmul.f32 0.6931472, %v1334_v49 }
 0x39b   :  { %v1178_v51 = vadd.f32 %v1177_v62, %v1693_v7 }
 0x39d   :  { %v1179_v53 = vsub.f32 %v1178_v51, %v1690_v4 }
 0x39f   :  { %v1181_v54 = vsel %vm1180_vm12, %v1179_v53, 0.0  ;;  %v1195_v50 = vrot.slane %v1179_v53, 4 }
 0x3a0   :  { %1182 = vadd.xlane.f32.xlu1 %v1181_v54 }
 0x3a1   :  { %v1197_v58 = vsel %vm1180_vm12, %v1195_v50, 0.0 }
 0x3a4   :  { %1198 = vadd.xlane.f32.xlu1 %v1197_v58 }
 0x42d   :  { %v1183_v1 = vpop.xlane.xlu1 %1182 }
 0x42e   :  { %v1184_v2 = vrot.slane %v1183_v1, 4 }
 0x430   :  { %v1185_v3 = vadd.f32 %v1184_v2, %v1183_v1 }
 0x431   :  { %v1199_v63 = vpop.xlane.xlu1 %1198 }
 0x432   :  { %v1186_v8 = vrot.slane %v1185_v3, 2  ;;  %v1200_v9 = vrot.slane %v1199_v63, 4 }
 0x434   :  { %v1201_v11 = vadd.f32 %v1200_v9, %v1199_v63  ;;  %v1187_v12 = vadd.f32 %v1186_v8, %v1185_v3 }
 0x436   :  { %v1202_v16 = vrot.slane %v1201_v11, 2  ;;  %v1188_v5 = vrot.slane %v1187_v12, 1 }
 0x438   :  { %v1203_v17 = vadd.f32 %v1202_v16, %v1201_v11  ;;  %v1189_v7 = vadd.f32 %v1188_v5, %v1187_v12 }
 0x43a   :  { %1281 = vpush %v1189_v7  ;;  %v1204_v22 = vrot.slane %v1203_v17, 1 }
 0x43c   :  { %v1205_v4 = vadd.f32 %v1204_v22, %v1203_v17 }
 0x43e   :  { %1283 = vpush %v1205_v4 }
 0x46b   :  { %s1282_s1 = spop %1281 }
 0x46c   :  { %s1191_s6 = smul.f32 0.5, %s1282_s1 }
 0x46e   :  { %1193 = sst [smem:[#allocation7]] %s1191_s6 }
 0x46f   :  { %s1284_s7 = spop %1283 }
 0x470   :  { %s1207_s8 = smul.f32 0.5, %s1284_s7 }
 0x472   :  { %1209 = sst [smem:[#allocation7 + $0x1]] %s1207_s8 }
 0x473   :  { %1388 = shalt.err (!%p1385_p4)
}
 0x474   :  { %s1403_s16 = smov [#allocation7]  }
 0x475   :  { %1217 = dma.smem_to_hbm %s1403_s16, 16, %s1724_s2, [#allocation4]  }
 0x476   :  { %1393 = dma.done.wait [#allocation4], 16  }
 0x477   :  { %1394 = vsyncadd [#allocation4], 4294967280 }
 0x478   :  { %1221 = sfence }
 0x479   :  { %1222 = vsyncpa [#allocation3], 1 }
 0x47a   :  { %1223 = vsyncpa [#allocation6], 1 }
 0x47b   :  { %1224 = vsyncpa [#allocation4], 1 }

</bundles_post_ra>
